<compile_context>
chip_gen: v6e
topology: v6e:2x2x1
jax: 0.10.0
libtpu: 0.0.40
codegen_flags: <defaults>
</compile_context>

<pallas_src>
import functools
import math

import jax
import jax.numpy as jnp
from jax.experimental import pallas as pl
from jax.experimental.pallas import tpu as pltpu


DEFAULT_VMEM_LIMIT = 48 * 1024 * 1024  # <= v7x physical (64 MiB), > all scoped defaults


def _round_up(x, m):
    return ((x + m - 1) // m) * m


def _bspec(block_shape, index_map, *, single_buffer=False):
    """BlockSpec helper.  Grid-invariant blocks can request single-buffering
    (no double-buffer VMEM waste); falls back gracefully if this JAX version
    does not expose pipeline_mode / pl.Buffered."""
    if single_buffer and hasattr(pl, "Buffered"):
        try:
            return pl.BlockSpec(block_shape, index_map,
                                pipeline_mode=pl.Buffered(1))
        except TypeError:
            pass
    return pl.BlockSpec(block_shape, index_map)


def _cost(flops, transcendentals, bytes_accessed):
    if hasattr(pl, "CostEstimate"):
        return pl.CostEstimate(flops=int(flops),
                               transcendentals=int(transcendentals),
                               bytes_accessed=int(bytes_accessed))
    return None


# ---------------------------------------------------------------------------
# Projection kernel: x @ W + b, emitted head-major (N, H, L, D).
# ---------------------------------------------------------------------------
def _head_projection_kernel(x_ref, w_ref, b_ref, out_ref, *, num_heads, head_dim):
    # x_ref: (1, TL, E) activations (already matmul dtype)
    # w_ref: (E, E) pre-transposed (in, out); b_ref: (1, E) f32
    # out_ref: (1, H, TL, D) head-major projection
    x = x_ref[0]
    y = jnp.dot(x, w_ref[...], preferred_element_type=jnp.float32) + b_ref[...]
    tl = y.shape[0]
    y = y.astype(out_ref.dtype).reshape(tl, num_heads, head_dim)
    # Single head-major relayout, once per sequence tile (instead of once per
    # attention grid step in the previous version).
    out_ref[0] = jnp.swapaxes(y, 0, 1)


def _project_to_heads(x, w_t, b_row, *, num_heads, head_dim, l_block,
                      vmem_limit_bytes):
    N, L, E = x.shape
    n_l = L // l_block
    mm_bytes = jnp.dtype(x.dtype).itemsize
    cost = _cost(
        flops=2 * N * L * E * E,
        transcendentals=0,
        bytes_accessed=(2 * N * L * E + E * E) * mm_bytes + E * 4)
    kernel = functools.partial(_head_projection_kernel,
                               num_heads=num_heads, head_dim=head_dim)
    return pl.pallas_call(
        kernel,
        out_shape=jax.ShapeDtypeStruct((N, num_heads, L, head_dim), x.dtype),
        grid_spec=pltpu.PrefetchScalarGridSpec(
            num_scalar_prefetch=0,
            grid=(N, n_l),
            in_specs=[
                _bspec((1, l_block, E), lambda b, li: (b, li, 0)),
                _bspec((E, E), lambda b, li: (0, 0), single_buffer=True),
                _bspec((1, E), lambda b, li: (0, 0), single_buffer=True),
            ],
            out_specs=_bspec((1, num_heads, l_block, head_dim),
                             lambda b, li: (b, 0, li, 0)),
        ),
        compiler_params=pltpu.CompilerParams(
            dimension_semantics=("parallel", "parallel"),
            vmem_limit_bytes=vmem_limit_bytes),
        cost_estimate=cost,
    )(x, w_t, b_row)


# ---------------------------------------------------------------------------
# Flash-style attention kernel (online softmax over key tiles) with fc_out
# fused in (per-head head-merge, no relayouts).
# ---------------------------------------------------------------------------
def _flash_attention_kernel(q_ref, k_ref, v_ref, wo_ref, bo_ref, out_ref,
                            m_scr, l_scr, acc_scr, *, num_heads, head_dim,
                            k_block, kv_len, mask_tail, matmul_dtype,
                            recip_approx, exp_dtype):
    ki = pl.program_id(2)

    @pl.when(ki == 0)
    def _():
        m_scr[...] = jnp.full_like(m_scr, -jnp.inf)
        l_scr[...] = jnp.zeros_like(l_scr)
        acc_scr[...] = jnp.zeros_like(acc_scr)

    q = q_ref[0]            # (H, TQ, D), head-major, matmul dtype
    k = k_ref[0]            # (H, TK, D)
    v = v_ref[0]            # (H, TK, D)

    # Scores with f32 MXU accumulation.  The 1/sqrt(E) scale is already folded
    # into the query projection weight/bias.
    s = jnp.einsum("hqd,hkd->hqk", q, k, preferred_element_type=jnp.float32)
    if mask_tail:
        # Only emitted when the key length was padded: mask padded key columns.
        col = k_block * ki + jax.lax.broadcasted_iota(jnp.int32, s.shape, 2)
        s = jnp.where(col < kv_len, s, -jnp.inf)

    m_prev = m_scr[...]
    m_new = jnp.maximum(m_prev, jnp.max(s, axis=-1, keepdims=True))
    alpha = jnp.exp(m_prev - m_new)
    shifted = s - m_new
    if exp_dtype is not None:
        # bf16 exp (v6e/v7x only — v5e EUP has no bf16); sums/rescale stay f32.
        p = jnp.exp(shifted.astype(exp_dtype)).astype(jnp.float32)
    else:
        p = jnp.exp(shifted)

    l_scr[...] = alpha * l_scr[...] + jnp.sum(p, axis=-1, keepdims=True)
    acc_scr[...] = alpha * acc_scr[...] + jnp.einsum(
        "hqk,hkd->hqd", p.astype(matmul_dtype), v,
        preferred_element_type=jnp.float32)
    m_scr[...] = m_new

    @pl.when(ki == pl.num_programs(2) - 1)
    def _():
        ctx = acc_scr[...] * pl.reciprocal(l_scr[...], approx=recip_approx)
        ctx = ctx.astype(matmul_dtype)                  # (H, TQ, D)
        # Head merge + fc_out as per-head (TQ, D) @ (D, E) accumulation against
        # the pre-split weight — no transpose / reshape relayout of the context.
        out = bo_ref[...]                               # (1, E) f32, broadcasts
        for h in range(num_heads):
            out = out + jnp.dot(ctx[h], wo_ref[h],
                                preferred_element_type=jnp.float32)
        out_ref[0] = out.astype(out_ref.dtype)


def _flash_attention(q_h, k_h, v_h, wo_heads, bo_row, *, out_dtype, q_block,
                     k_block, kv_len, mask_tail, matmul_dtype, recip_approx,
                     exp_dtype, vmem_limit_bytes):
    N, H, lq_pad, D = q_h.shape
    lk_pad = k_h.shape[2]
    E = H * D
    n_q = lq_pad // q_block
    n_k = lk_pad // k_block
    mm_bytes = jnp.dtype(matmul_dtype).itemsize
    cost = _cost(
        flops=N * (4 * H * lq_pad * lk_pad * D + 2 * lq_pad * E * E),
        transcendentals=N * H * lq_pad * lk_pad,
        bytes_accessed=(q_h.size + k_h.size + v_h.size + wo_heads.size) * mm_bytes
                       + bo_row.size * 4
                       + N * lq_pad * E * jnp.dtype(out_dtype).itemsize)
    kernel = functools.partial(
        _flash_attention_kernel, num_heads=H, head_dim=D, k_block=k_block,
        kv_len=kv_len, mask_tail=mask_tail, matmul_dtype=matmul_dtype,
        recip_approx=recip_approx, exp_dtype=exp_dtype)
    return pl.pallas_call(
        kernel,
        out_shape=jax.ShapeDtypeStruct((N, lq_pad, E), out_dtype),
        grid_spec=pltpu.PrefetchScalarGridSpec(
            num_scalar_prefetch=0,
            grid=(N, n_q, n_k),
            in_specs=[
                _bspec((1, H, q_block, D), lambda b, qi, ki: (b, 0, qi, 0)),
                _bspec((1, H, k_block, D), lambda b, qi, ki: (b, 0, ki, 0)),
                _bspec((1, H, k_block, D), lambda b, qi, ki: (b, 0, ki, 0)),
                _bspec((H, D, E), lambda b, qi, ki: (0, 0, 0), single_buffer=True),
                _bspec((1, E), lambda b, qi, ki: (0, 0), single_buffer=True),
            ],
            out_specs=_bspec((1, q_block, E), lambda b, qi, ki: (b, qi, 0)),
            scratch_shapes=[
                pltpu.VMEM((H, q_block, 1), jnp.float32),   # running max
                pltpu.VMEM((H, q_block, 1), jnp.float32),   # running sum
                pltpu.VMEM((H, q_block, D), jnp.float32),   # context accumulator
            ],
        ),
        compiler_params=pltpu.CompilerParams(
            dimension_semantics=("parallel", "parallel", "arbitrary"),
            vmem_limit_bytes=vmem_limit_bytes),
        cost_estimate=cost,
    )(q_h, k_h, v_h, wo_heads, bo_row)


# ---------------------------------------------------------------------------
# Public wrapper (mirrors SelfAttention.forward).
# ---------------------------------------------------------------------------
def self_attention(values, keys, query, mask, params, *, num_heads,
                   q_block=256, k_block=512, matmul_dtype=jnp.bfloat16,
                   recip_approx=True, exp_dtype=None,
                   vmem_limit_bytes=DEFAULT_VMEM_LIMIT):
    """values/keys/query: (N, L, E).  `mask` is accepted but unused because the
    reference forward never applies it.  Returns (N, Lq, E) in query.dtype.

    exp_dtype: optionally jnp.bfloat16 on v6e/v7x (faster EUP exp); keep the
    default (f32) on v5e or for strict numerics."""
    del mask  # the reference forward never applies the mask
    N, Lq, E = query.shape
    Lk = keys.shape[1]
    Lv = values.shape[1]
    assert Lk == Lv, "key_len must equal value_len"
    head_dim = E // num_heads
    assert head_dim * num_heads == E, "embedding_size must be divisible by num_heads"

    # Tile sizes (multiples of 8 sublanes); pad sequence lengths to the tile
    # size (+ in-kernel key-tail masking) instead of falling back to
    # whole-sequence blocks.
    q_blk = _round_up(min(q_block, Lq), 8)
    k_blk = _round_up(min(k_block, Lk), 8)
    lq_pad = _round_up(Lq, q_blk)
    lk_pad = _round_up(Lk, k_blk)
    mask_tail = lk_pad != Lk

    wq, bq = params["queries"]
    wk, bk = params["keys"]
    wv, bv = params["values"]
    wo, bo = params["fc_out"]

    scale = 1.0 / math.sqrt(float(E))  # reference scales by sqrt(embedding_size)

    # Pre-transpose projection weights to (in, out), fold the attention scale
    # into the query projection, cast weights once to the matmul dtype, and
    # pre-split fc_out's weight per head as (H, D, E) for transpose-free merge.
    wq_t = (wq.T * scale).astype(matmul_dtype)
    wk_t = wk.T.astype(matmul_dtype)
    wv_t = wv.T.astype(matmul_dtype)
    wo_heads = wo.T.reshape(num_heads, head_dim, E).astype(matmul_dtype)
    bq_r = (bq * scale).reshape(1, E).astype(jnp.float32)
    bk_r = bk.reshape(1, E).astype(jnp.float32)
    bv_r = bv.reshape(1, E).astype(jnp.float32)
    bo_r = bo.reshape(1, E).astype(jnp.float32)

    # Cast activations once in the wrapper (halves HBM->VMEM DMA) and pad.
    qx = query.astype(matmul_dtype)
    kx = keys.astype(matmul_dtype)
    vx = values.astype(matmul_dtype)
    if lq_pad != Lq:
        qx = jnp.pad(qx, ((0, 0), (0, lq_pad - Lq), (0, 0)))
    if lk_pad != Lk:
        kx = jnp.pad(kx, ((0, 0), (0, lk_pad - Lk), (0, 0)))
        vx = jnp.pad(vx, ((0, 0), (0, lk_pad - Lk), (0, 0)))

    # Projections run once per (batch, sequence tile) — never recomputed per
    # query tile — and emit head-major (N, H, L, D) tensors.
    proj = functools.partial(_project_to_heads, num_heads=num_heads,
                             head_dim=head_dim, vmem_limit_bytes=vmem_limit_bytes)
    q_h = proj(qx, wq_t, bq_r, l_block=q_blk)
    k_h = proj(kx, wk_t, bk_r, l_block=k_blk)
    v_h = proj(vx, wv_t, bv_r, l_block=k_blk)

    out = _flash_attention(
        q_h, k_h, v_h, wo_heads, bo_r, out_dtype=query.dtype,
        q_block=q_blk, k_block=k_blk, kv_len=Lk, mask_tail=mask_tail,
        matmul_dtype=matmul_dtype, recip_approx=recip_approx,
        exp_dtype=exp_dtype, vmem_limit_bytes=vmem_limit_bytes)

    if lq_pad != Lq:
        out = out[:, :Lq, :]
    return out


# ---------------------------------------------------------------------------
# Test harness.
# ---------------------------------------------------------------------------
def _init_linear(key, in_f, out_f):
    # Deterministic init roughly matching nn.Linear's uniform(-1/sqrt(in), 1/sqrt(in)).
    k1, k2 = jax.random.split(key)
    bound = 1.0 / math.sqrt(in_f)
    w = jax.random.uniform(k1, (out_f, in_f), jnp.float32, -bound, bound)
    b = jax.random.uniform(k2, (out_f,), jnp.float32, -bound, bound)
    return w, b


def _reference_jax(values, keys, query, params, num_heads):
    """Pure-JAX replica of the PyTorch forward for verification."""
    N, Lq, E = query.shape
    D = E // num_heads
    wq, bq = params["queries"]; wk, bk = params["keys"]
    wv, bv = params["values"]; wo, bo = params["fc_out"]
    q = query @ wq.T + bq
    k = keys @ wk.T + bk
    v = values @ wv.T + bv
    q = q.reshape(N, Lq, num_heads, D)
    k = k.reshape(N, -1, num_heads, D)
    v = v.reshape(N, -1, num_heads, D)
    energy = jnp.einsum("nqhd,nkhd->nhqk", q, k)
    attn = jax.nn.softmax(energy / math.sqrt(E), axis=3)
    out = jnp.einsum("nhql,nlhd->nqhd", attn, v).reshape(N, Lq, E)
    return out @ wo.T + bo


def _make_case(key, N, L, E):
    kv_, kk_, kq_, k1, k2, k3, k4 = jax.random.split(key, 7)
    values = jax.random.normal(kv_, (N, L, E), jnp.float32)
    keys = jax.random.normal(kk_, (N, L, E), jnp.float32)
    query = jax.random.normal(kq_, (N, L, E), jnp.float32)
    mask = jnp.ones((N, 1, 1, L), jnp.float32)  # unused by the reference forward
    params = {
        "values": _init_linear(k1, E, E),
        "keys": _init_linear(k2, E, E),
        "queries": _init_linear(k3, E, E),
        "fc_out": _init_linear(k4, E, E),
    }
    return values, keys, query, mask, params


if __name__ == "__main__":
    root = jax.random.PRNGKey(0)
    kcase1, kcase2 = jax.random.split(root)

    # Case 1: batch=2, seq=8, embed=32, heads=4 (tile-aligned path).
    N, L, E, H = 2, 8, 32, 4
    values, keys, query, mask, params = _make_case(kcase1, N, L, E)
    ref = _reference_jax(values, keys, query, params, H)

    # 1a) Strict-precision run (f32 matmuls + exact reciprocal): verifies the
    #     kernel's semantics against the PyTorch-equivalent reference.
    out_f32 = jax.block_until_ready(
        self_attention(values, keys, query, mask, params, num_heads=H,
                       matmul_dtype=jnp.float32, recip_approx=False))
    assert out_f32.shape == (N, L, E)
    assert jnp.allclose(out_f32, ref, atol=1e-4, rtol=1e-4), "f32 mismatch vs reference"

    # 1b) Default performance run: bf16 MXU operands, f32 accumulation, EUP
    #     approximate reciprocal.  Loose tolerance accounts only for bf16 rounding.
    out_fast = jax.block_until_ready(
        self_attention(values, keys, query, mask, params, num_heads=H))
    assert out_fast.shape == (N, L, E)
    assert jnp.allclose(out_fast, ref, atol=1e-1, rtol=1e-1), \
        "bf16 path diverged from reference beyond bf16 tolerance"

    # Case 2: seq=12 (not a multiple of 8) exercises the pad + key-tail masking
    # path that replaces the old whole-sequence fallback.
    N2, L2, E2, H2 = 2, 12, 32, 4
    values2, keys2, query2, mask2, params2 = _make_case(kcase2, N2, L2, E2)
    ref2 = _reference_jax(values2, keys2, query2, params2, H2)
    out2 = jax.block_until_ready(
        self_attention(values2, keys2, query2, mask2, params2, num_heads=H2,
                       matmul_dtype=jnp.float32, recip_approx=False))
    assert out2.shape == (N2, L2, E2)
    assert jnp.allclose(out2, ref2, atol=1e-4, rtol=1e-4), \
        "padded/masked path mismatch vs reference"

    print("KERNEL_OK")
</pallas_src>

<mosaic_0001>
module attributes {stable_mosaic.version = 11 : i64} {
  func.func @_head_projection_kernel(%arg0: i32, %arg1: i32, %arg2: memref<1x8x32xf32, #tpu.memory_space<vmem>>, %arg3: memref<32x32xf32, #tpu.memory_space<vmem>>, %arg4: memref<1x32xf32, #tpu.memory_space<vmem>>, %arg5: memref<1x4x8x8xf32, #tpu.memory_space<vmem>>) attributes {dimension_semantics = [#tpu.dimension_semantics<parallel>, #tpu.dimension_semantics<parallel>], iteration_bounds = array<i64: 2, 1>, scalar_prefetch = 0 : i64, scratch_operands = 0 : i64, tpu.core_type = #tpu.core_type<tc>, window_params = [{transform_indices = @transform_0, window_bounds = array<i64: 1, 8, 32>}, {pipeline_mode = #tpu.pipeline_mode<synchronous>, transform_indices = @transform_1, window_bounds = array<i64: 32, 32>}, {pipeline_mode = #tpu.pipeline_mode<synchronous>, transform_indices = @transform_2, window_bounds = array<i64: 1, 32>}, {transform_indices = @transform_3, window_bounds = array<i64: 1, 4, 8, 8>}]} {
    %c0 = arith.constant 0 : index
    %c0_0 = arith.constant 0 : index
    %c0_1 = arith.constant 0 : index
    %0 = vector.load %arg2[%c0, %c0_0, %c0_1] : memref<1x8x32xf32, #tpu.memory_space<vmem>>, vector<1x8x32xf32>
    %1 = vector.shape_cast %0 : vector<1x8x32xf32> to vector<8x32xf32>
    %c0_2 = arith.constant 0 : index
    %c0_3 = arith.constant 0 : index
    %2 = vector.load %arg3[%c0_2, %c0_3] : memref<32x32xf32, #tpu.memory_space<vmem>>, vector<32x32xf32>
    %cst = arith.constant dense<0.000000e+00> : vector<8x32xf32>
    %3 = tpu.matmul %1, %2, %cst {dimension_numbers = #tpu.dot_dimension_numbers<[1], [0], [0], [1], [0, 0, 1, 1], [], []>} : vector<8x32xf32>, vector<32x32xf32>, vector<8x32xf32> -> vector<8x32xf32>
    %c0_4 = arith.constant 0 : index
    %c0_5 = arith.constant 0 : index
    %4 = vector.load %arg4[%c0_4, %c0_5] : memref<1x32xf32, #tpu.memory_space<vmem>>, vector<1x32xf32>
    %5 = vector.broadcast %4 : vector<1x32xf32> to vector<8x32xf32>
    %6 = arith.addf %3, %5 : vector<8x32xf32>
    %7 = vector.shape_cast %6 : vector<8x32xf32> to vector<8x4x8xf32>
    %8 = tpu.transpose %7, [1, 0, 2] : vector<8x4x8xf32> -> vector<4x8x8xf32>
    %c0_6 = arith.constant 0 : index
    %c0_7 = arith.constant 0 : index
    %c0_8 = arith.constant 0 : index
    %c0_9 = arith.constant 0 : index
    %9 = vector.load %arg5[%c0_6, %c0_7, %c0_8, %c0_9] : memref<1x4x8x8xf32, #tpu.memory_space<vmem>>, vector<1x4x8x8xf32>
    %10 = vector.shape_cast %9 : vector<1x4x8x8xf32> to vector<4x8x8xf32>
    %11 = vector.shape_cast %8 : vector<4x8x8xf32> to vector<1x4x8x8xf32>
    tpu.vector_store %arg5[%c0_6, %c0_7, %c0_8, %c0_9], %11 {strides = array<i32>} : memref<1x4x8x8xf32, #tpu.memory_space<vmem>>, vector<1x4x8x8xf32>,
    return
  }
  func.func @transform_0(%arg0: i32, %arg1: i32) -> (i32, i32, i32) {
    %c0_i32 = arith.constant 0 : i32
    %c0_i32_0 = arith.constant 0 : i32
    return %arg0, %arg1, %c0_i32 : i32, i32, i32
  }
  func.func @transform_1(%arg0: i32, %arg1: i32) -> (i32, i32) {
    %c0_i32 = arith.constant 0 : i32
    %c0_i32_0 = arith.constant 0 : i32
    %c0_i32_1 = arith.constant 0 : i32
    return %c0_i32, %c0_i32_0 : i32, i32
  }
  func.func @transform_2(%arg0: i32, %arg1: i32) -> (i32, i32) {
    %c0_i32 = arith.constant 0 : i32
    %c0_i32_0 = arith.constant 0 : i32
    %c0_i32_1 = arith.constant 0 : i32
    return %c0_i32, %c0_i32_0 : i32, i32
  }
  func.func @transform_3(%arg0: i32, %arg1: i32) -> (i32, i32, i32, i32) {
    %c0_i32 = arith.constant 0 : i32
    %c0_i32_0 = arith.constant 0 : i32
    %c0_i32_1 = arith.constant 0 : i32
    return %arg0, %c0_i32, %arg1, %c0_i32_0 : i32, i32, i32, i32
  }
}

</mosaic_0001>

<bundles_post_ra>
// kernel: tpu_custom_call.1
= control target key start
LH: loop header
LB: loop body
LE: loop exit
PB: predicated region body
PF: predicated region fallthrough
CT: control target
= control target key end

     0   :  { %8 = vsyncpa [#allocation3], 0  ;;  %s1044_s0 = inlined_call_operand.hbm [shape: f32[2,8,32], index: 0, kind: input, shape index: {}]   ;;  %s1045_s1 = inlined_call_operand.hbm [shape: f32[32,32], index: 1, kind: input, shape index: {}]   ;;  %s1046_s2 = inlined_call_operand.vmem [shape: f32[1,32], index: 2, kind: input, shape index: {}]   ;;  %s1047_s3 = inlined_call_operand.hbm [shape: f32[2,4,8,8], index: 3, kind: output, shape index: {}]  }
   0x1   :  { %10 = vsyncpa [#allocation3 + $0x1], 0 }
   0x2   :  { %11 = vsyncpa [#allocation6], 0 }
   0x3   :  { %12 = vsyncpa [#allocation4], 0 }
   0x4   :  { %14 = vsyncpa [#allocation4 + $0x1], 0  ;;  %s859_s12 = smov 0   ;;  %s861_s13 = smov 0  }
   0x5   :  { %s863_s14 = smov 0   ;;  %s865_s15 = smov 0  }
   0x6   :  { %s867_s16 = smov 0   ;;  %s869_s17 = smov 0  }
   0x7 LB: > { %s564_s18 = sadd.s32 4294967295, %s823_s17   ;;  %s565_s19 = sadd.s32 4294967294, %s823_s17   ;;  %s823_s17 = sphi %s869_s17, %s20_s17   ;;  %s819_s16 = sphi %s867_s16, %s1065_s16   ;;  %s815_s15 = sphi %s865_s15, %s1064_s15   ;;  %s811_s14 = sphi %s863_s14, %s1063_s14   ;;  %s807_s13 = sphi %s861_s13, %s1062_s13   ;;  %s803_s12 = sphi %s859_s12, %s1061_s12  }
   0x8   : > { %p54_p0 = scmp.ne.s32.totalorder %s807_s13, %s803_s12  ;;  %p893_p1 = scmp.eq.s32.totalorder %s564_s18, 0 }
   0x9   : > { %p897_p2 = scmp.eq.s32.totalorder %s564_s18, 1  ;;  %p128_p3 = scmp.eq.s32.totalorder %s565_s19, 1 }
   0xa   : > { %p903_p4 = por %p893_p1, %p54_p0  ;;  %p566_p5 = scmp.ge.s32.totalorder %s823_s17, 1 }
   0xb   : > { %p908_p6 = por %p128_p3, %p54_p0  ;;  %p135_p7 = scmp.lt.s32.totalorder %s823_s17, 3 }
   0xc   : > { %s1051_s22 = scalar_select %p903_p4, 1, 0 }
   0xd   : > { %s1052_s23 = scalar_select %p908_p6, 1, 0 }
   0xe   : > { %p913_p8 = pnand %p566_p5, %p135_p7  ;;  %s825_s25 = smov [#allocation5]  }
   0xf   : > { %s147_s26 = sshll.u32 %s825_s25, 4  ;;  %s32_s28 = sadd.s32 1, %s819_s16  ;;  %s148_s26 = int_to_ptr.vmem [resolvable:$true] %s147_s26 }
  0x10   : > { %p609_p9 = pneg %p913_p8  ;;  %s696_s29 = scalar_lea.vmem %s148_s26, 512 }
  0x11   : > { %p697_p13 = scmp.ne.s32.totalorder %s148_s26, %s696_s29  ;;  %p704_p5 = scmp.lt.s32.totalorder %s148_s26, %s148_s26 }
  0x12   : > { %p922_p11 = pnand %p609_p9, %p893_p1  ;;  %p705_p7 = scmp.lt.s32.totalorder %s696_s29, %s696_s29 }
  0x14   : > { %p687_p12 = pneg %p922_p11  ;;  %p706_p6 = por %p705_p7, %p704_p5 }
  0x16   : > { %p699_p0 = pnand %p697_p13, %p687_p12 }
  0x18   : > { %p700_p3 = pneg %p699_p0 }
  0x1a   : > { %p707_p4 = pnand %p706_p6, %p700_p3 }
  0x1c   : > { %710 = shalt.err (!%p707_p4)
}
  0x1d   : > { %s826_s30 = smov 128   ;;  %s827_s4 = smov 8  }
  0x1e   : > { %612 = dma.hbm_to_vmem [thread:$0]  (!%p922_p11), %s1045_s1, 512, %s148_s26, [#allocation6], %s826_s30, %s826_s30, %s827_s4  }
  0x1f   : > { %p34_p6 = scmp.ge.s32.totalorder %s32_s28, 2  ;;  %s41_s7 = sadd.s32 1, %s811_s14 }
  0x20   : > { %p48_p4 = scmp.ne.s32.totalorder %s811_s14, %s807_s13  ;;  %p49_p9 = scmp.eq.s32.totalorder %s823_s17, 0 }
  0x21   : > { %s1067_s28 = smov (%p34_p6, %s32_s28), 0  ;;  %p622_p0 = scmp.lt.s32.totalorder %s823_s17, 2 }
  0x22   : > { %p940_p12 = por %p49_p9, %p48_p4  ;;  %p946_p13 = por %p897_p2, %p48_p4 }
  0x23   : > { %s36_s10 = ssub.s32 %s819_s16, %s1067_s28  ;;  %s164_s11 = sand.u32 1, %s811_s14  }
  0x24   : > { %p39_p11 = scmp.eq.s32.totalorder %s36_s10, 0  ;;  %s569_s18 = sshll.u32 %s164_s11, 3 }
  0x25   : > { %s570_s25 = sshll.u32 %s819_s16, 7  ;;  %s168_s30 = scalar_lea.vmem [#allocation2], %s569_s18 }
  0x26   : > { %s955_s19 = scalar_select %p39_p11, %s811_s14, %s41_s7  }
  0x27   : > { %s174_s29 = scalar_lea.hbm %s1044_s0, %s570_s25  ;;  %s176_s4 = sshll.u32 %s168_s30, 4  ;;  %s177_s4 = int_to_ptr.vmem [resolvable:$true] %s176_s4 }
  0x28   : > { %p963_p2 = pnand %p622_p0, %p940_p12  ;;  %s165_s5 = scalar_lea.sflag [#allocation3], %s164_s11 }
  0x29   : > { %s724_s6 = scalar_lea.vmem %s177_s4, 128  ;;  %s828_s7 = smov [#allocation2]  }
  0x2a   : > { %p713_p3 = pneg %p963_p2  ;;  %p725_p5 = scmp.ne.s32.totalorder %s177_s4, %s724_s6 }
  0x2b   : > { %s729_s10 = sshll.u32 %s828_s7, 4  ;;  %s730_s10 = int_to_ptr.vmem [resolvable:$false] %s729_s10 }
  0x2c   : > { %p727_p7 = pnand %p725_p5, %p713_p3  ;;  %s731_s25 = scalar_lea.vmem %s730_s10, 256 }
  0x2d   : > { %p732_p4 = scmp.lt.s32.totalorder %s177_s4, %s730_s10  ;;  %p733_p9 = scmp.lt.s32.totalorder %s731_s25, %s724_s6 }
  0x2e   : > { %p728_p6 = pneg %p727_p7 }
  0x2f   : > { %p734_p11 = por %p733_p9, %p732_p4 }
  0x31   : > { %p735_p10 = pnand %p734_p11, %p728_p6 }
  0x33   : > { %738 = shalt.err (!%p735_p10)
}
  0x34   : > { %616 = dma.hbm_to_vmem [thread:$0]  (!%p963_p2), %s174_s29, 128, %s177_s4, %s165_s5  }
  0x35   : > { %185 = sbr.rel (%p913_p8) target bundleno = 417 (0x1a1), region = 32  ;;  %s974_s8 = sand.u32 (!%p913_p8), 1, %s807_s13  }
  0x36   : > { %s572_s11 = sshll.u32 (!%p913_p8), %s974_s8, 3  ;;  %s188_s18 = scalar_lea.sflag (!%p913_p8), [#allocation3], %s974_s8 }
  0x37   : > { %s191_s26 = scalar_lea.vmem (!%p913_p8), [#allocation2], %s572_s11  ;;  %p1058_p12 = scmp.ne.s32.totalorder (!%p913_p8), %s1051_s22, 0 }
  0x3a   : > { %790 = dma.done.wait (%p1058_p12), %s188_s18, 128  }
  0x3b   : > { %792 = vsyncadd (%p1058_p12), %s188_s18, 4294967168 }
  0x3c   : > { %794 = dma.done.wait (%p893_p1), [#allocation6], 512  }
  0x3d   : > { %796 = vsyncadd (%p893_p1), [#allocation6], 4294966784  ;;  %v829_v0 = vmov 0.0   ;;  %vm830_vm0 = vmmov 0   ;;  %v222_v1 = vld [vmem:[#allocation5 + $0x18] sm:$0xff]  ;;  %v221_v2 = vld [vmem:[#allocation5 + $0x10] sm:$0xff]  ;;  %v319_v12 = vlaneseq }
  0x3e   : > { %590 = vmatprep.subr.mxu0 %v829_v0  ;;  %598 = vmatprep.mubr.msk.f32.mxu0 %vm830_vm0, %v829_v0  ;;  %v220_v3 = vld [vmem:[#allocation5 + $0x8] sm:$0xff]  ;;  %v219_v4 = vld [vmem:[#allocation5] sm:$0xff]  ;;  %v218_v5 = vld [vmem:[%s191_s26] sm:$0xff]  ;;  %vm230_vm1 = vcmask 261120   ;;  %s831_s24 = smov 104   ;;  %s832_s27 = smov 120  }
  0x3f   : > { %591 = vmatpush3.msra.mxu0 %v222_v1  ;;  %v575_v6 = vld [vmem:[%s1046_s2] ss:$0 sm:$0xff]  ;;  %s833_s29 = smov 112   ;;  %v834_v10 = vmov 1983009808   ;;  %v320_v16 = vshrl.u32 %v319_v12, 7 }
  0x40   : > { %592 = vmatprep.subr.mxu0 %v829_v0  ;;  %v317_v11 = vunpack.c.l.s4 %v834_v10  ;;  %v835_v13 = vmov 1934713408   ;;  %s574_s30 = sshll.u32 %s974_s8, 5  ;;  %s584_s4 = sshll.u32 %s815_s15, 9  ;;  %vm450_vm2 = vcmask 64512  }
  0x41   : > { %593 = vmatpush3.msra.mxu0 %v221_v2  ;;  %v349_v14 = vunpack.c.l.s4 %v835_v13  ;;  %s217_s21 = scalar_lea.vmem [#allocation7], %s574_s30  ;;  %s994_s10 = scalar_lea.hbm %s1047_s3, %s584_s4 }
  0x42   : > { %594 = vmatprep.subr.mxu0 %v829_v0  ;;  %v318_v15 = vunpack.c.0.s8 %v317_v11  ;;  %s470_s5 = sshll.u32 %s217_s21, 4  ;;  %s456_s15 = scalar_lea.sflag [#allocation4], %s974_s8  ;;  %s996_s5 = int_to_ptr.vmem [resolvable:$true] %s470_s5 }
  0x43   : > { %595 = vmatpush3.msra.mxu0 %v220_v3  ;;  %v350_v19 = vunpack.c.0.s8 %v349_v14  ;;  %s739_s25 = scalar_lea.vmem %s996_s5, 512  ;;  %s836_s11 = smov [#allocation7]  }
  0x44   : > { %596 = vmatprep.subr.mxu0 %v829_v0  ;;  %v321_v20 = vsub.s32 %v318_v15, %v320_v16  ;;  %p740_p1 = scmp.ne.s32.totalorder %s996_s5, %s739_s25  ;;  %s743_s18 = sshll.u32 %s836_s11, 4  ;;  %s744_s18 = int_to_ptr.vmem [resolvable:$false] %s743_s18 }
  0x45   : > { %597 = vmatpush3.msra.mxu0 %v219_v4  ;;  %v353_v26 = vsub.s32 %v350_v19, %v320_v16  ;;  %s745_s26 = scalar_lea.vmem %s744_s18, 1024  ;;  %p746_p0 = scmp.lt.s32.totalorder %s996_s5, %s744_s18 }
  0x46   : > { %599 = vmatmul.mubr.msk.f32.vlgmr.msra.gmra.mxu0 %vm230_vm1, %v218_v5  ;;  %p741_p8 = pnand %p740_p1, %p946_p13  ;;  %p747_p2 = scmp.lt.s32.totalorder %s745_s26, %s739_s25 }
  0x48   : > { %p742_p10 = pneg %p741_p8  ;;  %p748_p3 = por %p747_p2, %p746_p0 }
  0x4a   : > { %p749_p5 = pnand %p748_p3, %p742_p10 }
 0x106   : > { %v300_v7 = vpop.f32.mrf.mxu0 }
 0x107   : > { %v301_v8 = vadd.f32 %v575_v6, %v300_v7 }
 0x108   : > { %v600_v9 = vpop.f32.mrf.mxu0 }
 0x109   : > { %311 = vrot.lane.b32.xlu1 %v301_v8, %s831_s24  ;;  %305 = vrot.lane.b32.xlu0 %v301_v8, %s832_s27 }
 0x10d   : > { %308 = vrot.lane.b32.xlu0 %v301_v8, %s833_s29 }
 0x17b   : > { %v312_v17 = vpop.permute.xlu1 %311  ;;  %v306_v18 = vpop.permute.xlu0 %305 }
 0x17c   : > { %v330_v21 = vcombine.low %v306_v18, %v312_v17  ;;  %v331_v22 = vcombine.high %v306_v18, %v312_v17 }
 0x17e   : > { %v338_v27 = vrot.slane %v330_v21, %v321_v20  ;;  %v345_v28 = vrot.slane %v331_v22, %v321_v20 }
 0x17f   : > { %v309_v23 = vpop.permute.xlu0 %308 }
 0x180   : > { %v314_v24 = vcombine.low %v301_v8, %v309_v23  ;;  %v315_v25 = vcombine.high %v301_v8, %v309_v23 }
 0x182   : > { %v322_v29 = vrot.slane %v314_v24, %v321_v20  ;;  %v329_v30 = vrot.slane %v315_v25, %v321_v20 }
 0x184   : > { %v346_v31 = vcombine.low %v322_v29, %v338_v27  ;;  %v347_v32 = vcombine.high %v322_v29, %v338_v27  ;;  %v362_v33 = vcombine.low %v329_v30, %v345_v28  ;;  %v363_v34 = vcombine.high %v329_v30, %v345_v28 }
 0x186   : > { %v354_v35 = vrot.slane %v346_v31, %v353_v26  ;;  %v361_v36 = vrot.slane %v347_v32, %v353_v26  ;;  %v370_v37 = vrot.slane %v362_v33, %v353_v26  ;;  %v377_v38 = vrot.slane %v363_v34, %v353_v26 }
 0x188   : > { %v382_v39 = vcombine.low %v354_v35, %v361_v36  ;;  %v577_v40 = vcombine.high %v354_v35, %v361_v36  ;;  %v398_v41 = vcombine.low %v370_v37, %v377_v38  ;;  %v578_v42 = vcombine.high %v370_v37, %v377_v38 }
 0x18a   : > { %v389_v43 = vrot.slane %v382_v39, %v321_v20  ;;  %v397_v44 = vrot.slane %v577_v40, %v321_v20  ;;  %v405_v45 = vrot.slane %v398_v41, %v321_v20  ;;  %v413_v46 = vrot.slane %v578_v42, %v321_v20 }
 0x18c   : > { %v414_v47 = vcombine.low %v389_v43, %v397_v44  ;;  %v415_v48 = vcombine.high %v389_v43, %v397_v44  ;;  %v430_v49 = vcombine.low %v405_v45, %v413_v46  ;;  %v431_v50 = vcombine.high %v405_v45, %v413_v46 }
 0x18e   : > { %v422_v51 = vrot.slane %v414_v47, %v353_v26  ;;  %v429_v52 = vrot.slane %v415_v48, %v353_v26  ;;  %v438_v53 = vrot.slane %v430_v49, %v353_v26  ;;  %v445_v54 = vrot.slane %v431_v50, %v353_v26 }
 0x190   : > { %v446_v55 = vcombine.low %v422_v51, %v438_v53  ;;  %v447_v56 = vcombine.high %v422_v51, %v438_v53  ;;  %v448_v57 = vcombine.low %v429_v52, %v445_v54  ;;  %v449_v58 = vcombine.high %v429_v52, %v445_v54 }
 0x192   : > { %451 = vst.msk [vmem:[%s217_s21] sm:$0xff] %vm450_vm2, %v446_v55  ;;  %452 = vst.msk [vmem:[%s217_s21 + $0x8] sm:$0xff] %vm450_vm2, %v447_v56 }
 0x193   : > { %453 = vst.msk [vmem:[%s217_s21 + $0x10] sm:$0xff] %vm450_vm2, %v448_v57  ;;  %454 = vst.msk [vmem:[%s217_s21 + $0x18] sm:$0xff] %vm450_vm2, %v449_v58 }
 0x194   : > { %752 = shalt.err (!%p749_p5)
}
 0x195   : > { %s753_s20 = scalar_lea.hbm %s994_s10, 512  ;;  %s757_s27 = scalar_lea.hbm %s1047_s3, 1024 }
 0x196   : > { %p754_p7 = scmp.ne.s32.totalorder %s994_s10, %s753_s20  ;;  %p758_p9 = scmp.lt.s32.totalorder %s994_s10, %s1047_s3 }
 0x197   : > { %p759_p11 = scmp.lt.s32.totalorder %s757_s27, %s753_s20 }
 0x198   : > { %p755_p6 = pnand %p754_p7, %p946_p13 }
 0x199   : > { %p760_p12 = por %p759_p11, %p758_p9 }
 0x19a   : > { %p756_p4 = pneg %p755_p6 }
 0x19c   : > { %p761_p1 = pnand %p760_p12, %p756_p4 }
 0x19e   : > { %764 = shalt.err (!%p761_p1)
}
 0x19f   : > { %s837_s4 = smov 128   ;;  %s838_s21 = smov 8  }
 0x1a0   : > { %607 = dma.vmem_to_hbm [thread:$0]  (%p946_p13), %s996_s5, 512, %s994_s10, %s456_s15, %s837_s4, %s837_s4, %s838_s21  }
 0x1a1 PF: > { %s485_s6 = sand.u32 1, %s803_s12   ;;  %p1059_p8 = scmp.ne.s32.totalorder %s1052_s23, 0 }
 0x1a2   : > { %p1060_p10 = scmp.ge.s32.totalorder %s823_s17, 2  ;;  %s486_s7 = scalar_lea.sflag [#allocation4], %s485_s6 }
 0x1a4   : > { %p618_p0 = pnand %p1060_p10, %p1059_p8 }
 0x1a6   : > { %p619_p2 = pneg %p618_p0 }
 0x1a8   : > { %798 = dma.done.wait (%p619_p2), %s486_s7, 512  }
 0x1a9   : > { %800 = vsyncadd (%p619_p2), %s486_s7, 4294966784  ;;  %s20_s17 = sadd.s32 1, %s823_s17   ;;  %s1061_s12 = smov %s807_s13 }
 0x1aa   : > { %p17_p3 = scmp.ge.s32.totalorder %s20_s17, 4   ;;  %s1062_s13 = smov %s811_s14 }
 0x1ab   : > { %s1063_s14 = smov %s955_s19  ;;  %s1064_s15 = smov %s819_s16 }
 0x1ac   : > { %s1065_s16 = smov %s1067_s28  ;;  %19 = sbr.rel (!%p17_p3) target bundleno = 7 (0x7), region = 81 }
 0x1b1   :  { %491 = vsyncpa [#allocation3], 1 }
 0x1b2   :  { %493 = vsyncpa [#allocation3 + $0x1], 1 }
 0x1b3   :  { %494 = vsyncpa [#allocation6], 1 }
 0x1b4   :  { %495 = vsyncpa [#allocation4], 1 }
 0x1b5   :  { %497 = vsyncpa [#allocation4 + $0x1], 1 }

</bundles_post_ra>
